<compile_context>
chip_gen: v6e
topology: v6e:2x2x1
jax: 0.10.0
libtpu: 0.0.40
codegen_flags: <defaults>
</compile_context>

<pallas_src>
import jax
import jax.numpy as jnp
import numpy as np
from jax.experimental import pallas as pl
from jax.experimental.pallas import tpu as pltpu


# ----------------------------------------------------------------------------
# Helpers
# ----------------------------------------------------------------------------
def _round_up(x, m):
    return (x + m - 1) // m * m


def _pad2(a, rows, cols):
    return jnp.pad(a, ((0, rows - a.shape[0]), (0, cols - a.shape[1])))


def _choose_tiles(n):
    """Row tile tm, contraction tile tk and padded node count n_pad.

    Both tiles divide n_pad, are multiples of 128 (lane/sublane friendly) and
    are sized for the 2x256x256 MXU on v6e/v7x; tm is kept small enough that
    the parallel row axis has >= 2 grid steps whenever the graph allows it
    (v7x megacore).  VMEM use is O(tm*tk) bf16 + O(tm*128) f32, independent
    of N, so no N-dependent cap is needed anymore.
    """
    n128 = _round_up(n, 128)
    if n128 <= 128:
        return 128, 128, 128
    n_pad = _round_up(n128, 256)
    tm = 256 if n_pad >= 512 else 128          # >=2 row steps when possible
    tk = 512 if (n_pad % 512 == 0 and n_pad >= 1024) else 256
    return tm, tk, n_pad


def _vmem_limit_bytes():
    """Generation-aware VMEM limit (128 MiB chips get more headroom)."""
    try:
        cap = getattr(pltpu.get_tpu_info(), "vmem_capacity_bytes", None)
    except Exception:
        cap = None
    if not cap:
        return 48 * 1024 * 1024                # safe on every generation
    return min((int(cap) * 3) // 4, 100 * 1024 * 1024)


def _compiler_params(dim_sems):
    return pltpu.CompilerParams(
        dimension_semantics=dim_sems,
        vmem_limit_bytes=_vmem_limit_bytes(),
    )


# ----------------------------------------------------------------------------
# Kernels
# ----------------------------------------------------------------------------
def _xw_kernel(x_ref, w_ref, o_ref):
    """o_tile = x_tile @ W1   (bf16 MXU operands, f32 accumulation, no bias)."""
    o_ref[...] = jnp.dot(
        x_ref[...], w_ref[...], preferred_element_type=jnp.float32
    ).astype(o_ref.dtype)


def _agg1_kernel(a_ref, xw_ref, b1_ref, w2_ref, o_ref, acc_ref):
    """K-tiled:  acc += A(i,k) @ XW1(k);  at k==last: o = relu(acc+b1) @ W2."""
    @pl.when(pl.program_id(1) == 0)
    def _():
        acc_ref[...] = jnp.zeros_like(acc_ref)

    acc_ref[...] += jnp.dot(
        a_ref[...], xw_ref[...], preferred_element_type=jnp.float32
    )

    @pl.when(pl.program_id(1) == pl.num_programs(1) - 1)
    def _():
        h = jnp.maximum(acc_ref[...] + b1_ref[...], 0.0)
        o_ref[...] = jnp.dot(
            h.astype(w2_ref.dtype), w2_ref[...], preferred_element_type=jnp.float32
        ).astype(o_ref.dtype)


def _agg2_kernel(a_ref, hw_ref, b2_ref, o_ref, acc_ref):
    """K-tiled:  acc += A(i,k) @ HW2(k);  at k==last: o = acc + b2."""
    @pl.when(pl.program_id(1) == 0)
    def _():
        acc_ref[...] = jnp.zeros_like(acc_ref)

    acc_ref[...] += jnp.dot(
        a_ref[...], hw_ref[...], preferred_element_type=jnp.float32
    )

    @pl.when(pl.program_id(1) == pl.num_programs(1) - 1)
    def _():
        o_ref[...] = (acc_ref[...] + b2_ref[...]).astype(o_ref.dtype)


# ----------------------------------------------------------------------------
# Tiled pallas_call wrappers
# ----------------------------------------------------------------------------
def _tiled_xw(x, w, tm):
    n_pad, f_pad = x.shape
    h_pad = w.shape[1]
    return pl.pallas_call(
        _xw_kernel,
        out_shape=jax.ShapeDtypeStruct((n_pad, h_pad), jnp.bfloat16),
        grid=(n_pad // tm,),
        in_specs=[
            pl.BlockSpec((tm, f_pad), lambda i: (i, 0)),       # X row tile (pipelined)
            pl.BlockSpec((f_pad, h_pad), lambda i: (0, 0)),    # W1 resident
        ],
        out_specs=pl.BlockSpec((tm, h_pad), lambda i: (i, 0)),
        compiler_params=_compiler_params(("parallel",)),
    )(x, w)


def _tiled_agg1(a_hat, xw1, b1, w2, tm, tk):
    n_pad = a_hat.shape[0]
    h_pad = xw1.shape[1]
    o_pad = w2.shape[1]
    return pl.pallas_call(
        _agg1_kernel,
        out_shape=jax.ShapeDtypeStruct((n_pad, o_pad), jnp.bfloat16),
        grid=(n_pad // tm, n_pad // tk),
        in_specs=[
            pl.BlockSpec((tm, tk), lambda i, k: (i, k)),         # A block
            pl.BlockSpec((tk, h_pad), lambda i, k: (k, 0)),      # XW1 k-slab
            pl.BlockSpec((1, h_pad), lambda i, k: (0, 0)),       # b1 (tiny)
            pl.BlockSpec((h_pad, o_pad), lambda i, k: (0, 0)),   # W2 (tiny)
        ],
        out_specs=pl.BlockSpec((tm, o_pad), lambda i, k: (i, 0)),  # resident across k
        scratch_shapes=[pltpu.VMEM((tm, h_pad), jnp.float32)],     # f32 accumulator
        compiler_params=_compiler_params(("parallel", "arbitrary")),
    )(a_hat, xw1, b1, w2)


def _tiled_agg2(a_hat, hw2, b2, tm, tk):
    n_pad = a_hat.shape[0]
    o_pad = hw2.shape[1]
    return pl.pallas_call(
        _agg2_kernel,
        out_shape=jax.ShapeDtypeStruct((n_pad, o_pad), jnp.float32),
        grid=(n_pad // tm, n_pad // tk),
        in_specs=[
            pl.BlockSpec((tm, tk), lambda i, k: (i, k)),         # A block
            pl.BlockSpec((tk, o_pad), lambda i, k: (k, 0)),      # HW2 k-slab
            pl.BlockSpec((1, o_pad), lambda i, k: (0, 0)),       # b2 (tiny)
        ],
        out_specs=pl.BlockSpec((tm, o_pad), lambda i, k: (i, 0)),  # resident across k
        scratch_shapes=[pltpu.VMEM((tm, o_pad), jnp.float32)],     # f32 accumulator
        compiler_params=_compiler_params(("parallel", "arbitrary")),
    )(a_hat, hw2, b2)


# ----------------------------------------------------------------------------
# Forward pass (matches GNNCustomized.forward up to the final squeeze)
# ----------------------------------------------------------------------------
@jax.jit
def gnn_forward(a_hat, x, w1, b1, w2, b2):
    """Returns [N, output_dim] float32."""
    n, f = x.shape
    h = w1.shape[1]
    o = w2.shape[1]

    tm, tk, n_pad = _choose_tiles(n)
    f_pad = _round_up(f, 128)
    h_pad = _round_up(h, 128)
    o_pad = _round_up(o, 128)   # lane-dense output stores; sliced below

    # Zero-pad to lane/sublane friendly shapes; cast MXU operands to bf16.
    # Note: padded rows of HW2 equal relu(b1) @ W2 (not zero) when b1 != 0,
    # but the corresponding zero columns of A cancel them in pass 3, so the
    # final result for the real rows is unaffected.
    a_p = _pad2(a_hat, n_pad, n_pad).astype(jnp.bfloat16)
    x_p = _pad2(x, n_pad, f_pad).astype(jnp.bfloat16)
    w1_p = _pad2(w1, f_pad, h_pad).astype(jnp.bfloat16)
    w2_p = _pad2(w2, h_pad, o_pad).astype(jnp.bfloat16)
    b1_p = _pad2(b1.reshape(1, -1), 1, h_pad).astype(jnp.float32)
    b2_p = _pad2(b2.reshape(1, -1), 1, o_pad).astype(jnp.float32)

    # 1) XW1 = X @ W1                       (computed once, no dummy bias input)
    xw1 = _tiled_xw(x_p, w1_p, tm)
    # 2) HW2 = relu(A @ XW1 + b1) @ W2      (K-tiled accumulator, fused epilogue)
    hw2 = _tiled_agg1(a_p, xw1, b1_p, w2_p, tm, tk)
    # 3) OUT = A @ HW2 + b2                 (K-tiled accumulator)
    out = _tiled_agg2(a_p, hw2, b2_p, tm, tk)

    return out[:n, :o]


# ----------------------------------------------------------------------------
# Glue (plain JAX): normalized dense adjacency from edge_index, init, reference
# ----------------------------------------------------------------------------
def build_norm_adj(edge_index, num_nodes):
    """A_hat = D^{-1/2} (A + I) D^{-1/2}, matching torch_geometric gcn_norm."""
    src = edge_index[0]
    dst = edge_index[1]
    a = jnp.zeros((num_nodes, num_nodes), jnp.float32)
    a = a.at[dst, src].add(1.0)                     # messages flow src -> dst
    a = a + jnp.eye(num_nodes, dtype=jnp.float32)   # self-loops
    deg = a.sum(axis=1)
    dinv = jnp.where(deg > 0.0, 1.0 / jnp.sqrt(deg), 0.0)
    return dinv[:, None] * a * dinv[None, :]


def glorot(key, shape):
    fan_in, fan_out = shape
    limit = jnp.sqrt(6.0 / (fan_in + fan_out))
    return jax.random.uniform(key, shape, jnp.float32, -limit, limit)


def gcn_reference(a_hat, x, w1, b1, w2, b2):
    h = jnp.maximum(a_hat @ (x @ w1) + b1, 0.0)
    return a_hat @ (h @ w2) + b2


if __name__ == "__main__":
    # Small deterministic example consistent with the module's forward:
    # N nodes, input_dim features, hidden_dim hidden units, output_dim=1
    # so x.squeeze(-1) drops the trailing dim like in PyTorch.
    N = 16
    INPUT_DIM = 8
    HIDDEN_DIM = 32
    OUTPUT_DIM = 1

    key = jax.random.PRNGKey(0)
    k_x, k_e, k_w1, k_w2, k_b1, k_b2 = jax.random.split(key, 6)

    x = jax.random.normal(k_x, (N, INPUT_DIM), jnp.float32)

    E = 48
    edge_index = jax.random.randint(k_e, (2, E), 0, N, jnp.int32)

    # GCNConv parameters (glorot weights; small nonzero biases to exercise the
    # bias path — PyG default init is zero, but any value is valid at forward).
    w1 = glorot(k_w1, (INPUT_DIM, HIDDEN_DIM))
    b1 = 0.05 * jax.random.normal(k_b1, (1, HIDDEN_DIM), jnp.float32)
    w2 = glorot(k_w2, (HIDDEN_DIM, OUTPUT_DIM))
    b2 = 0.05 * jax.random.normal(k_b2, (1, OUTPUT_DIM), jnp.float32)

    a_hat = build_norm_adj(edge_index, N)

    out = gnn_forward(a_hat, x, w1, b1, w2, b2)
    jax.block_until_ready(out)

    # Loose tolerance: kernel uses bf16 MXU operands with f32 accumulation.
    ref = gcn_reference(a_hat, x, w1, b1, w2, b2)
    np.testing.assert_allclose(np.asarray(out), np.asarray(ref), atol=0.1, rtol=0.1)

    out = jnp.squeeze(out, axis=-1)  # matches torch .squeeze(-1) since OUTPUT_DIM == 1
    assert out.shape == (N,), out.shape
    print("KERNEL_OK")
</pallas_src>

<mosaic_0001>
module attributes {stable_mosaic.version = 11 : i64} {
  func.func @_xw_kernel(%arg0: i32, %arg1: memref<128x128xbf16, #tpu.memory_space<vmem>>, %arg2: memref<128x128xbf16, #tpu.memory_space<vmem>>, %arg3: memref<128x128xbf16, #tpu.memory_space<vmem>>) attributes {dimension_semantics = [#tpu.dimension_semantics<parallel>], iteration_bounds = array<i64: 1>, scalar_prefetch = 0 : i64, scratch_operands = 0 : i64, tpu.core_type = #tpu.core_type<tc>, window_params = [{transform_indices = @transform_0, window_bounds = array<i64: 128, 128>}, {pipeline_mode = #tpu.pipeline_mode<synchronous>, transform_indices = @transform_1, window_bounds = array<i64: 128, 128>}, {transform_indices = @transform_2, window_bounds = array<i64: 128, 128>}]} {
    %c0 = arith.constant 0 : index
    %c0_0 = arith.constant 0 : index
    %0 = vector.load %arg1[%c0, %c0_0] : memref<128x128xbf16, #tpu.memory_space<vmem>>, vector<128x128xbf16>
    %c0_1 = arith.constant 0 : index
    %c0_2 = arith.constant 0 : index
    %1 = vector.load %arg2[%c0_1, %c0_2] : memref<128x128xbf16, #tpu.memory_space<vmem>>, vector<128x128xbf16>
    %cst = arith.constant dense<0.000000e+00> : vector<128x128xf32>
    %2 = tpu.matmul %0, %1, %cst {dimension_numbers = #tpu.dot_dimension_numbers<[1], [0], [0], [1], [0, 0, 1, 1], [], []>} : vector<128x128xbf16>, vector<128x128xbf16>, vector<128x128xf32> -> vector<128x128xf32>
    %3 = arith.truncf %2 : vector<128x128xf32> to vector<128x128xbf16>
    %c0_3 = arith.constant 0 : index
    %c0_4 = arith.constant 0 : index
    %4 = vector.load %arg3[%c0_3, %c0_4] : memref<128x128xbf16, #tpu.memory_space<vmem>>, vector<128x128xbf16>
    tpu.vector_store %arg3[%c0_3, %c0_4], %3 {strides = array<i32>} : memref<128x128xbf16, #tpu.memory_space<vmem>>, vector<128x128xbf16>,
    return
  }
  func.func @transform_0(%arg0: i32) -> (i32, i32) {
    %c0_i32 = arith.constant 0 : i32
    %c0_i32_0 = arith.constant 0 : i32
    return %arg0, %c0_i32 : i32, i32
  }
  func.func @transform_1(%arg0: i32) -> (i32, i32) {
    %c0_i32 = arith.constant 0 : i32
    %c0_i32_0 = arith.constant 0 : i32
    %c0_i32_1 = arith.constant 0 : i32
    return %c0_i32, %c0_i32_0 : i32, i32
  }
  func.func @transform_2(%arg0: i32) -> (i32, i32) {
    %c0_i32 = arith.constant 0 : i32
    %c0_i32_0 = arith.constant 0 : i32
    return %arg0, %c0_i32 : i32, i32
  }
}

module attributes {stable_mosaic.version = 11 : i64} {
  func.func @_agg2_kernel(%arg0: i32, %arg1: i32, %arg2: memref<128x128xbf16, #tpu.memory_space<vmem>>, %arg3: memref<128x128xbf16, #tpu.memory_space<vmem>>, %arg4: memref<1x128xf32, #tpu.memory_space<vmem>>, %arg5: memref<128x128xf32, #tpu.memory_space<vmem>>, %arg6: memref<128x128xf32, #tpu.memory_space<vmem>>) attributes {dimension_semantics = [#tpu.dimension_semantics<parallel>, #tpu.dimension_semantics<arbitrary>], iteration_bounds = array<i64: 1, 1>, scalar_prefetch = 0 : i64, scratch_operands = 1 : i64, tpu.core_type = #tpu.core_type<tc>, window_params = [{transform_indices = @transform_0, window_bounds = array<i64: 128, 128>}, {transform_indices = @transform_1, window_bounds = array<i64: 128, 128>}, {pipeline_mode = #tpu.pipeline_mode<synchronous>, transform_indices = @transform_2, window_bounds = array<i64: 1, 128>}, {transform_indices = @transform_3, window_bounds = array<i64: 128, 128>}]} {
    %c0_i32 = arith.constant 0 : i32
    %0 = arith.cmpi eq, %arg1, %c0_i32 : i32
    %1 = arith.extui %0 : i1 to i32
    %c0_i32_0 = arith.constant 0 : i32
    %2 = arith.cmpi ne, %1, %c0_i32_0 : i32
    scf.if %2 {
      %cst_10 = arith.constant 0.000000e+00 : f32
      %12 = vector.broadcast %cst_10 : f32 to vector<128x128xf32>
      %c0_11 = arith.constant 0 : index
      %c0_12 = arith.constant 0 : index
      %13 = vector.load %arg6[%c0_11, %c0_12] : memref<128x128xf32, #tpu.memory_space<vmem>>, vector<128x128xf32>
      tpu.vector_store %arg6[%c0_11, %c0_12], %12 {strides = array<i32>} : memref<128x128xf32, #tpu.memory_space<vmem>>, vector<128x128xf32>,
    } else {
    }
    %c0 = arith.constant 0 : index
    %c0_1 = arith.constant 0 : index
    %3 = vector.load %arg6[%c0, %c0_1] : memref<128x128xf32, #tpu.memory_space<vmem>>, vector<128x128xf32>
    %c0_2 = arith.constant 0 : index
    %c0_3 = arith.constant 0 : index
    %4 = vector.load %arg2[%c0_2, %c0_3] : memref<128x128xbf16, #tpu.memory_space<vmem>>, vector<128x128xbf16>
    %c0_4 = arith.constant 0 : index
    %c0_5 = arith.constant 0 : index
    %5 = vector.load %arg3[%c0_4, %c0_5] : memref<128x128xbf16, #tpu.memory_space<vmem>>, vector<128x128xbf16>
    %cst = arith.constant dense<0.000000e+00> : vector<128x128xf32>
    %6 = tpu.matmul %4, %5, %cst {dimension_numbers = #tpu.dot_dimension_numbers<[1], [0], [0], [1], [0, 0, 1, 1], [], []>} : vector<128x128xbf16>, vector<128x128xbf16>, vector<128x128xf32> -> vector<128x128xf32>
    %7 = arith.addf %3, %6 : vector<128x128xf32>
    %c0_6 = arith.constant 0 : index
    %c0_7 = arith.constant 0 : index
    %8 = vector.load %arg6[%c0_6, %c0_7] : memref<128x128xf32, #tpu.memory_space<vmem>>, vector<128x128xf32>
    tpu.vector_store %arg6[%c0_6, %c0_7], %7 {strides = array<i32>} : memref<128x128xf32, #tpu.memory_space<vmem>>, vector<128x128xf32>,
    %c0_i32_8 = arith.constant 0 : i32
    %9 = arith.cmpi eq, %arg1, %c0_i32_8 : i32
    %10 = arith.extui %9 : i1 to i32
    %c0_i32_9 = arith.constant 0 : i32
    %11 = arith.cmpi ne, %10, %c0_i32_9 : i32
    scf.if %11 {
      %c0_10 = arith.constant 0 : index
      %c0_11 = arith.constant 0 : index
      %12 = vector.load %arg6[%c0_10, %c0_11] : memref<128x128xf32, #tpu.memory_space<vmem>>, vector<128x128xf32>
      %c0_12 = arith.constant 0 : index
      %c0_13 = arith.constant 0 : index
      %13 = vector.load %arg4[%c0_12, %c0_13] : memref<1x128xf32, #tpu.memory_space<vmem>>, vector<1x128xf32>
      %14 = vector.broadcast %13 : vector<1x128xf32> to vector<128x128xf32>
      %15 = arith.addf %12, %14 : vector<128x128xf32>
      %c0_14 = arith.constant 0 : index
      %c0_15 = arith.constant 0 : index
      %16 = vector.load %arg5[%c0_14, %c0_15] : memref<128x128xf32, #tpu.memory_space<vmem>>, vector<128x128xf32>
      tpu.vector_store %arg5[%c0_14, %c0_15], %15 {strides = array<i32>} : memref<128x128xf32, #tpu.memory_space<vmem>>, vector<128x128xf32>,
    } else {
    }
    return
  }
  func.func @transform_0(%arg0: i32, %arg1: i32) -> (i32, i32) {
    %c0_i32 = arith.constant 0 : i32
    return %arg0, %arg1 : i32, i32
  }
  func.func @transform_1(%arg0: i32, %arg1: i32) -> (i32, i32) {
    %c0_i32 = arith.constant 0 : i32
    %c0_i32_0 = arith.constant 0 : i32
    return %arg1, %c0_i32 : i32, i32
  }
  func.func @transform_2(%arg0: i32, %arg1: i32) -> (i32, i32) {
    %c0_i32 = arith.constant 0 : i32
    %c0_i32_0 = arith.constant 0 : i32
    %c0_i32_1 = arith.constant 0 : i32
    return %c0_i32, %c0_i32_0 : i32, i32
  }
  func.func @transform_3(%arg0: i32, %arg1: i32) -> (i32, i32) {
    %c0_i32 = arith.constant 0 : i32
    %c0_i32_0 = arith.constant 0 : i32
    return %arg0, %c0_i32 : i32, i32
  }
}

module attributes {stable_mosaic.version = 11 : i64} {
  func.func @_agg1_kernel(%arg0: i32, %arg1: i32, %arg2: memref<128x128xbf16, #tpu.memory_space<vmem>>, %arg3: memref<128x128xbf16, #tpu.memory_space<vmem>>, %arg4: memref<1x128xf32, #tpu.memory_space<vmem>>, %arg5: memref<128x128xbf16, #tpu.memory_space<vmem>>, %arg6: memref<128x128xbf16, #tpu.memory_space<vmem>>, %arg7: memref<128x128xf32, #tpu.memory_space<vmem>>) attributes {dimension_semantics = [#tpu.dimension_semantics<parallel>, #tpu.dimension_semantics<arbitrary>], iteration_bounds = array<i64: 1, 1>, scalar_prefetch = 0 : i64, scratch_operands = 1 : i64, tpu.core_type = #tpu.core_type<tc>, window_params = [{transform_indices = @transform_0, window_bounds = array<i64: 128, 128>}, {transform_indices = @transform_1, window_bounds = array<i64: 128, 128>}, {pipeline_mode = #tpu.pipeline_mode<synchronous>, transform_indices = @transform_2, window_bounds = array<i64: 1, 128>}, {pipeline_mode = #tpu.pipeline_mode<synchronous>, transform_indices = @transform_3, window_bounds = array<i64: 128, 128>}, {transform_indices = @transform_4, window_bounds = array<i64: 128, 128>}]} {
    %c0_i32 = arith.constant 0 : i32
    %0 = arith.cmpi eq, %arg1, %c0_i32 : i32
    %1 = arith.extui %0 : i1 to i32
    %c0_i32_0 = arith.constant 0 : i32
    %2 = arith.cmpi ne, %1, %c0_i32_0 : i32
    scf.if %2 {
      %cst_10 = arith.constant 0.000000e+00 : f32
      %12 = vector.broadcast %cst_10 : f32 to vector<128x128xf32>
      %c0_11 = arith.constant 0 : index
      %c0_12 = arith.constant 0 : index
      %13 = vector.load %arg7[%c0_11, %c0_12] : memref<128x128xf32, #tpu.memory_space<vmem>>, vector<128x128xf32>
      tpu.vector_store %arg7[%c0_11, %c0_12], %12 {strides = array<i32>} : memref<128x128xf32, #tpu.memory_space<vmem>>, vector<128x128xf32>,
    } else {
    }
    %c0 = arith.constant 0 : index
    %c0_1 = arith.constant 0 : index
    %3 = vector.load %arg7[%c0, %c0_1] : memref<128x128xf32, #tpu.memory_space<vmem>>, vector<128x128xf32>
    %c0_2 = arith.constant 0 : index
    %c0_3 = arith.constant 0 : index
    %4 = vector.load %arg2[%c0_2, %c0_3] : memref<128x128xbf16, #tpu.memory_space<vmem>>, vector<128x128xbf16>
    %c0_4 = arith.constant 0 : index
    %c0_5 = arith.constant 0 : index
    %5 = vector.load %arg3[%c0_4, %c0_5] : memref<128x128xbf16, #tpu.memory_space<vmem>>, vector<128x128xbf16>
    %cst = arith.constant dense<0.000000e+00> : vector<128x128xf32>
    %6 = tpu.matmul %4, %5, %cst {dimension_numbers = #tpu.dot_dimension_numbers<[1], [0], [0], [1], [0, 0, 1, 1], [], []>} : vector<128x128xbf16>, vector<128x128xbf16>, vector<128x128xf32> -> vector<128x128xf32>
    %7 = arith.addf %3, %6 : vector<128x128xf32>
    %c0_6 = arith.constant 0 : index
    %c0_7 = arith.constant 0 : index
    %8 = vector.load %arg7[%c0_6, %c0_7] : memref<128x128xf32, #tpu.memory_space<vmem>>, vector<128x128xf32>
    tpu.vector_store %arg7[%c0_6, %c0_7], %7 {strides = array<i32>} : memref<128x128xf32, #tpu.memory_space<vmem>>, vector<128x128xf32>,
    %c0_i32_8 = arith.constant 0 : i32
    %9 = arith.cmpi eq, %arg1, %c0_i32_8 : i32
    %10 = arith.extui %9 : i1 to i32
    %c0_i32_9 = arith.constant 0 : i32
    %11 = arith.cmpi ne, %10, %c0_i32_9 : i32
    scf.if %11 {
      %c0_10 = arith.constant 0 : index
      %c0_11 = arith.constant 0 : index
      %12 = vector.load %arg7[%c0_10, %c0_11] : memref<128x128xf32, #tpu.memory_space<vmem>>, vector<128x128xf32>
      %c0_12 = arith.constant 0 : index
      %c0_13 = arith.constant 0 : index
      %13 = vector.load %arg4[%c0_12, %c0_13] : memref<1x128xf32, #tpu.memory_space<vmem>>, vector<1x128xf32>
      %14 = vector.broadcast %13 : vector<1x128xf32> to vector<128x128xf32>
      %15 = arith.addf %12, %14 : vector<128x128xf32>
      %cst_14 = arith.constant 0.000000e+00 : f32
      %16 = vector.broadcast %cst_14 : f32 to vector<128x128xf32>
      %17 = arith.maximumf %15, %16 : vector<128x128xf32>
      %18 = arith.truncf %17 : vector<128x128xf32> to vector<128x128xbf16>
      %c0_15 = arith.constant 0 : index
      %c0_16 = arith.constant 0 : index
      %19 = vector.load %arg5[%c0_15, %c0_16] : memref<128x128xbf16, #tpu.memory_space<vmem>>, vector<128x128xbf16>
      %cst_17 = arith.constant dense<0.000000e+00> : vector<128x128xf32>
      %20 = tpu.matmul %18, %19, %cst_17 {dimension_numbers = #tpu.dot_dimension_numbers<[1], [0], [0], [1], [0, 0, 1, 1], [], []>} : vector<128x128xbf16>, vector<128x128xbf16>, vector<128x128xf32> -> vector<128x128xf32>
      %21 = arith.truncf %20 : vector<128x128xf32> to vector<128x128xbf16>
      %c0_18 = arith.constant 0 : index
      %c0_19 = arith.constant 0 : index
      %22 = vector.load %arg6[%c0_18, %c0_19] : memref<128x128xbf16, #tpu.memory_space<vmem>>, vector<128x128xbf16>
      tpu.vector_store %arg6[%c0_18, %c0_19], %21 {strides = array<i32>} : memref<128x128xbf16, #tpu.memory_space<vmem>>, vector<128x128xbf16>,
    } else {
    }
    return
  }
  func.func @transform_0(%arg0: i32, %arg1: i32) -> (i32, i32) {
    %c0_i32 = arith.constant 0 : i32
    return %arg0, %arg1 : i32, i32
  }
  func.func @transform_1(%arg0: i32, %arg1: i32) -> (i32, i32) {
    %c0_i32 = arith.constant 0 : i32
    %c0_i32_0 = arith.constant 0 : i32
    return %arg1, %c0_i32 : i32, i32
  }
  func.func @transform_2(%arg0: i32, %arg1: i32) -> (i32, i32) {
    %c0_i32 = arith.constant 0 : i32
    %c0_i32_0 = arith.constant 0 : i32
    %c0_i32_1 = arith.constant 0 : i32
    return %c0_i32, %c0_i32_0 : i32, i32
  }
  func.func @transform_3(%arg0: i32, %arg1: i32) -> (i32, i32) {
    %c0_i32 = arith.constant 0 : i32
    %c0_i32_0 = arith.constant 0 : i32
    %c0_i32_1 = arith.constant 0 : i32
    return %c0_i32, %c0_i32_0 : i32, i32
  }
  func.func @transform_4(%arg0: i32, %arg1: i32) -> (i32, i32) {
    %c0_i32 = arith.constant 0 : i32
    %c0_i32_0 = arith.constant 0 : i32
    return %arg0, %c0_i32 : i32, i32
  }
}

</mosaic_0001>

<bundles_post_ra>
// kernel: gnn_forward.5
= control target key start
LH: loop header
LB: loop body
LE: loop exit
PB: predicated region body
PF: predicated region fallthrough
CT: control target
= control target key end

     0   :  { %s586_s1 = inlined_call_operand.vmem [shape: bf16[128,128], index: 1, kind: input, shape index: {}]   ;;  %s587_s0 = inlined_call_operand.vmem [shape: bf16[128,128], index: 0, kind: input, shape index: {}]   ;;  %s588_s2 = inlined_call_operand.vmem [shape: f32[1,128], index: 2, kind: input, shape index: {}]   ;;  %s589_s3 = inlined_call_operand.vmem [shape: f32[128,128], index: 3, kind: output, shape index: {}]  }
   0x1   :  { %v451_v0 = vld [vmem:[%s586_s1 + $0x38] sm:$0xff]   ;;  %v452_v1 = vld [vmem:[%s586_s1 + $0x30] sm:$0xff]   ;;  %v453_v2 = vld [vmem:[%s586_s1 + $0x28] sm:$0xff]  }
   0x2   :  { %403 = vmatprep.subr.bf16.mxu0 %v451_v0  ;;  %435 = vmatprep.subr.bf16.mxu1 %v451_v0  ;;  %v454_v3 = vld [vmem:[%s586_s1 + $0x20] sm:$0xff]   ;;  %v455_v6 = vld [vmem:[%s586_s1 + $0x18] sm:$0xff]   ;;  %v456_v7 = vld [vmem:[%s586_s1 + $0x10] sm:$0xff]  }
   0x3   :  { %404 = vmatpush3.bf16.msra.mxu0 %v451_v0  ;;  %443 = vmatpush3.bf16.msra.mxu1 %v451_v0  ;;  %v459_v4 = vld [vmem:[%s587_s0] sm:$0xff]   ;;  %v457_v8 = vld [vmem:[%s586_s1 + $0x8] sm:$0xff]   ;;  %v463_v12 = vld [vmem:[%s587_s0 + $0x10] sm:$0xff]  }
   0x4   :  { %405 = vmatprep.subr.bf16.mxu0 %v452_v1  ;;  %436 = vmatprep.subr.bf16.mxu1 %v452_v1  ;;  %v460_v5 = vld [vmem:[%s587_s0 + $0x20] sm:$0xff]   ;;  %v461_v10 = vld [vmem:[%s587_s0 + $0x8] sm:$0xff]   ;;  %v464_v13 = vld [vmem:[%s587_s0 + $0x30] sm:$0xff]  }
   0x5   :  { %419 = vmatprep.mubr.bf16.mxu0 %v459_v4  ;;  %427 = vmatprep.mubr.bf16.mxu1 %v460_v5  ;;  %v458_v9 = vld [vmem:[%s586_s1] sm:$0xff]   ;;  %v462_v11 = vld [vmem:[%s587_s0 + $0x28] sm:$0xff]   ;;  %v465_v14 = vld [vmem:[%s587_s0 + $0x18] sm:$0xff]  }
   0x6   :  { %v466_v15 = vld [vmem:[%s587_s0 + $0x38] sm:$0xff]   ;;  %v386_v16 = vld [vmem:[%s588_s2] ss:$0 sm:$0xff] }
   0x7   :  { %406 = vmatpush3.bf16.msra.mxu0 %v452_v1  ;;  %444 = vmatpush3.bf16.msra.mxu1 %v452_v1 }
   0x8   :  { %407 = vmatprep.subr.bf16.mxu0 %v453_v2  ;;  %437 = vmatprep.subr.bf16.mxu1 %v453_v2 }
   0xb   :  { %408 = vmatpush3.bf16.msra.mxu0 %v453_v2  ;;  %445 = vmatpush3.bf16.msra.mxu1 %v453_v2 }
   0xc   :  { %409 = vmatprep.subr.bf16.mxu0 %v454_v3  ;;  %438 = vmatprep.subr.bf16.mxu1 %v454_v3 }
   0xf   :  { %410 = vmatpush3.bf16.msra.mxu0 %v454_v3  ;;  %446 = vmatpush3.bf16.msra.mxu1 %v454_v3 }
  0x10   :  { %411 = vmatprep.subr.bf16.mxu0 %v455_v6  ;;  %439 = vmatprep.subr.bf16.mxu1 %v455_v6 }
  0x13   :  { %412 = vmatpush3.bf16.msra.mxu0 %v455_v6  ;;  %447 = vmatpush3.bf16.msra.mxu1 %v455_v6 }
  0x14   :  { %413 = vmatprep.subr.bf16.mxu0 %v456_v7  ;;  %440 = vmatprep.subr.bf16.mxu1 %v456_v7 }
  0x17   :  { %414 = vmatpush3.bf16.msra.mxu0 %v456_v7  ;;  %448 = vmatpush3.bf16.msra.mxu1 %v456_v7 }
  0x18   :  { %415 = vmatprep.subr.bf16.mxu0 %v457_v8  ;;  %441 = vmatprep.subr.bf16.mxu1 %v457_v8 }
  0x1b   :  { %416 = vmatpush3.bf16.msra.mxu0 %v457_v8  ;;  %449 = vmatpush3.bf16.msra.mxu1 %v457_v8 }
  0x1c   :  { %417 = vmatprep.subr.bf16.mxu0 %v458_v9  ;;  %442 = vmatprep.subr.bf16.mxu1 %v458_v9 }
  0x1f   :  { %418 = vmatpush3.bf16.msra.mxu0 %v458_v9  ;;  %450 = vmatpush3.bf16.msra.mxu1 %v458_v9 }
  0x22   :  { %420 = vmatmul.mubr.bf16.vlgmr.msra.gmra.mxu0 %v461_v10  ;;  %428 = vmatmul.mubr.bf16.vlgmr.msra.gmra.mxu1 %v462_v11 }
  0x23   :  { %423 = vmatprep.mubr.bf16.mxu0 %v463_v12  ;;  %431 = vmatprep.mubr.bf16.mxu1 %v464_v13 }
  0x2a   :  { %424 = vmatmul.mubr.bf16.gmra.mxu0 %v465_v14  ;;  %432 = vmatmul.mubr.bf16.gmra.mxu1 %v466_v15 }
  0xe2   :  { %v421_v17 = vpop.f32.mrf.mxu0  ;;  %v429_v18 = vpop.f32.mrf.mxu1 }
  0xe3   :  { %v336_v19 = vadd.f32 %v421_v17, %v386_v16  ;;  %v344_v20 = vadd.f32 %v429_v18, %v386_v16 }
  0xe4   :  { %v213_v21 = vpop.f32.mrf.mxu0  ;;  %v245_v22 = vpop.f32.mrf.mxu1 }
  0xe5   :  { %352 = vst [vmem:[%s589_s3 + $0x10] sm:$0xff] %v336_v19  ;;  %360 = vst [vmem:[%s589_s3 + $0x50] sm:$0xff] %v344_v20  ;;  %v334_v23 = vadd.f32 %v386_v16, %v213_v21  ;;  %v342_v24 = vadd.f32 %v386_v16, %v245_v22 }
  0xe6   :  { %v422_v25 = vpop.f32.mrf.mxu0  ;;  %v430_v26 = vpop.f32.mrf.mxu1 }
  0xe7   :  { %350 = vst [vmem:[%s589_s3] sm:$0xff] %v334_v23  ;;  %358 = vst [vmem:[%s589_s3 + $0x40] sm:$0xff] %v342_v24  ;;  %v337_v27 = vadd.f32 %v422_v25, %v386_v16  ;;  %v345_v28 = vadd.f32 %v430_v26, %v386_v16 }
  0xe8   :  { %v216_v29 = vpop.f32.mrf.mxu0  ;;  %v248_v30 = vpop.f32.mrf.mxu1 }
  0xe9   :  { %353 = vst [vmem:[%s589_s3 + $0x18] sm:$0xff] %v337_v27  ;;  %361 = vst [vmem:[%s589_s3 + $0x58] sm:$0xff] %v345_v28  ;;  %v335_v31 = vadd.f32 %v386_v16, %v216_v29  ;;  %v343_v32 = vadd.f32 %v386_v16, %v248_v30 }
  0xea   :  { %v425_v33 = vpop.f32.mrf.mxu0  ;;  %v433_v34 = vpop.f32.mrf.mxu1 }
  0xeb   :  { %351 = vst [vmem:[%s589_s3 + $0x8] sm:$0xff] %v335_v31  ;;  %359 = vst [vmem:[%s589_s3 + $0x48] sm:$0xff] %v343_v32  ;;  %v340_v35 = vadd.f32 %v425_v33, %v386_v16  ;;  %v348_v36 = vadd.f32 %v433_v34, %v386_v16 }
  0xec   :  { %v229_v37 = vpop.f32.mrf.mxu0  ;;  %v261_v38 = vpop.f32.mrf.mxu1 }
  0xed   :  { %356 = vst [vmem:[%s589_s3 + $0x30] sm:$0xff] %v340_v35  ;;  %364 = vst [vmem:[%s589_s3 + $0x70] sm:$0xff] %v348_v36  ;;  %v338_v39 = vadd.f32 %v386_v16, %v229_v37  ;;  %v346_v40 = vadd.f32 %v386_v16, %v261_v38 }
  0xee   :  { %v426_v41 = vpop.f32.mrf.mxu0  ;;  %v434_v42 = vpop.f32.mrf.mxu1 }
  0xef   :  { %354 = vst [vmem:[%s589_s3 + $0x20] sm:$0xff] %v338_v39  ;;  %362 = vst [vmem:[%s589_s3 + $0x60] sm:$0xff] %v346_v40  ;;  %v341_v43 = vadd.f32 %v426_v41, %v386_v16  ;;  %v349_v44 = vadd.f32 %v434_v42, %v386_v16 }
  0xf0   :  { %v232_v45 = vpop.f32.mrf.mxu0  ;;  %v264_v46 = vpop.f32.mrf.mxu1 }
  0xf1   :  { %357 = vst [vmem:[%s589_s3 + $0x38] sm:$0xff] %v341_v43  ;;  %365 = vst [vmem:[%s589_s3 + $0x78] sm:$0xff] %v349_v44  ;;  %v339_v47 = vadd.f32 %v386_v16, %v232_v45  ;;  %v347_v48 = vadd.f32 %v386_v16, %v264_v46 }
  0xf3   :  { %355 = vst [vmem:[%s589_s3 + $0x28] sm:$0xff] %v339_v47  ;;  %363 = vst [vmem:[%s589_s3 + $0x68] sm:$0xff] %v347_v48 }

// kernel: gnn_forward.3
= control target key start
LH: loop header
LB: loop body
LE: loop exit
PB: predicated region body
PF: predicated region fallthrough
CT: control target
= control target key end

     0   :  { %s583_s1 = inlined_call_operand.vmem [shape: bf16[128,128], index: 1, kind: input, shape index: {}]   ;;  %s584_s0 = inlined_call_operand.vmem [shape: bf16[128,128], index: 0, kind: input, shape index: {}]   ;;  %s585_s2 = inlined_call_operand.vmem [shape: bf16[128,128], index: 2, kind: output, shape index: {}]  }
   0x1   :  { %v480_v0 = vld [vmem:[%s583_s1 + $0x38] sm:$0xff]   ;;  %v481_v1 = vld [vmem:[%s583_s1 + $0x30] sm:$0xff]   ;;  %v482_v2 = vld [vmem:[%s583_s1 + $0x28] sm:$0xff]  }
   0x2   :  { %432 = vmatprep.subr.bf16.mxu0 %v480_v0  ;;  %464 = vmatprep.subr.bf16.mxu1 %v480_v0  ;;  %v483_v3 = vld [vmem:[%s583_s1 + $0x20] sm:$0xff]   ;;  %v484_v6 = vld [vmem:[%s583_s1 + $0x18] sm:$0xff]   ;;  %v485_v7 = vld [vmem:[%s583_s1 + $0x10] sm:$0xff]  }
   0x3   :  { %433 = vmatpush3.bf16.msra.mxu0 %v480_v0  ;;  %472 = vmatpush3.bf16.msra.mxu1 %v480_v0  ;;  %v488_v4 = vld [vmem:[%s584_s0] sm:$0xff]   ;;  %v486_v8 = vld [vmem:[%s583_s1 + $0x8] sm:$0xff]   ;;  %v492_v12 = vld [vmem:[%s584_s0 + $0x10] sm:$0xff]  }
   0x4   :  { %434 = vmatprep.subr.bf16.mxu0 %v481_v1  ;;  %465 = vmatprep.subr.bf16.mxu1 %v481_v1  ;;  %v489_v5 = vld [vmem:[%s584_s0 + $0x20] sm:$0xff]   ;;  %v490_v10 = vld [vmem:[%s584_s0 + $0x8] sm:$0xff]   ;;  %v493_v13 = vld [vmem:[%s584_s0 + $0x30] sm:$0xff]  }
   0x5   :  { %448 = vmatprep.mubr.bf16.mxu0 %v488_v4  ;;  %456 = vmatprep.mubr.bf16.mxu1 %v489_v5  ;;  %v487_v9 = vld [vmem:[%s583_s1] sm:$0xff]   ;;  %v491_v11 = vld [vmem:[%s584_s0 + $0x28] sm:$0xff]   ;;  %v494_v14 = vld [vmem:[%s584_s0 + $0x18] sm:$0xff]  }
   0x6   :  { %v495_v15 = vld [vmem:[%s584_s0 + $0x38] sm:$0xff]  }
   0x7   :  { %435 = vmatpush3.bf16.msra.mxu0 %v481_v1  ;;  %473 = vmatpush3.bf16.msra.mxu1 %v481_v1 }
   0x8   :  { %436 = vmatprep.subr.bf16.mxu0 %v482_v2  ;;  %466 = vmatprep.subr.bf16.mxu1 %v482_v2 }
   0xb   :  { %437 = vmatpush3.bf16.msra.mxu0 %v482_v2  ;;  %474 = vmatpush3.bf16.msra.mxu1 %v482_v2 }
   0xc   :  { %438 = vmatprep.subr.bf16.mxu0 %v483_v3  ;;  %467 = vmatprep.subr.bf16.mxu1 %v483_v3 }
   0xf   :  { %439 = vmatpush3.bf16.msra.mxu0 %v483_v3  ;;  %475 = vmatpush3.bf16.msra.mxu1 %v483_v3 }
  0x10   :  { %440 = vmatprep.subr.bf16.mxu0 %v484_v6  ;;  %468 = vmatprep.subr.bf16.mxu1 %v484_v6 }
  0x13   :  { %441 = vmatpush3.bf16.msra.mxu0 %v484_v6  ;;  %476 = vmatpush3.bf16.msra.mxu1 %v484_v6 }
  0x14   :  { %442 = vmatprep.subr.bf16.mxu0 %v485_v7  ;;  %469 = vmatprep.subr.bf16.mxu1 %v485_v7 }
  0x17   :  { %443 = vmatpush3.bf16.msra.mxu0 %v485_v7  ;;  %477 = vmatpush3.bf16.msra.mxu1 %v485_v7 }
  0x18   :  { %444 = vmatprep.subr.bf16.mxu0 %v486_v8  ;;  %470 = vmatprep.subr.bf16.mxu1 %v486_v8 }
  0x1b   :  { %445 = vmatpush3.bf16.msra.mxu0 %v486_v8  ;;  %478 = vmatpush3.bf16.msra.mxu1 %v486_v8 }
  0x1c   :  { %446 = vmatprep.subr.bf16.mxu0 %v487_v9  ;;  %471 = vmatprep.subr.bf16.mxu1 %v487_v9 }
  0x1f   :  { %447 = vmatpush3.bf16.msra.mxu0 %v487_v9  ;;  %479 = vmatpush3.bf16.msra.mxu1 %v487_v9 }
  0x22   :  { %449 = vmatmul.mubr.bf16.vlgmr.msra.gmra.mxu0 %v490_v10  ;;  %457 = vmatmul.mubr.bf16.vlgmr.msra.gmra.mxu1 %v491_v11 }
  0x23   :  { %452 = vmatprep.mubr.bf16.mxu0 %v492_v12  ;;  %460 = vmatprep.mubr.bf16.mxu1 %v493_v13 }
  0x2a   :  { %453 = vmatmul.mubr.bf16.gmra.mxu0 %v494_v14  ;;  %461 = vmatmul.mubr.bf16.gmra.mxu1 %v495_v15 }
  0xe2   :  { %v450_v16 = vpop.f32.mrf.mxu0  ;;  %v458_v17 = vpop.f32.mrf.mxu1 }
  0xe4   :  { %v174_v18 = vpop.f32.mrf.mxu0  ;;  %v206_v19 = vpop.f32.mrf.mxu1 }
  0xe6   :  { %v451_v20 = vpop.f32.mrf.mxu0  ;;  %v459_v21 = vpop.f32.mrf.mxu1 }
  0xe7   :  { %v377_v22 = vpack.c.bf16 %v451_v20, %v450_v16  ;;  %v397_v23 = vpack.c.bf16 %v459_v21, %v458_v17 }
  0xe8   :  { %v177_v24 = vpop.f32.mrf.mxu0  ;;  %v209_v25 = vpop.f32.mrf.mxu1 }
  0xe9   :  { %409 = vst [vmem:[%s585_s2 + $0x8] sm:$0xff] %v377_v22   ;;  %413 = vst [vmem:[%s585_s2 + $0x28] sm:$0xff] %v397_v23   ;;  %v372_v26 = vpack.c.bf16 %v177_v24, %v174_v18  ;;  %v392_v27 = vpack.c.bf16 %v209_v25, %v206_v19 }
  0xea   :  { %v454_v28 = vpop.f32.mrf.mxu0  ;;  %v462_v29 = vpop.f32.mrf.mxu1 }
  0xeb   :  { %373 = vst [vmem:[%s585_s2] sm:$0xff] %v372_v26   ;;  %412 = vst [vmem:[%s585_s2 + $0x20] sm:$0xff] %v392_v27  }
  0xec   :  { %v190_v30 = vpop.f32.mrf.mxu0  ;;  %v222_v31 = vpop.f32.mrf.mxu1 }
  0xee   :  { %v455_v32 = vpop.f32.mrf.mxu0  ;;  %v463_v33 = vpop.f32.mrf.mxu1 }
  0xef   :  { %v387_v34 = vpack.c.bf16 %v455_v32, %v454_v28  ;;  %v407_v35 = vpack.c.bf16 %v463_v33, %v462_v29 }
  0xf0   :  { %v193_v36 = vpop.f32.mrf.mxu0  ;;  %v225_v37 = vpop.f32.mrf.mxu1 }
  0xf1   :  { %411 = vst [vmem:[%s585_s2 + $0x18] sm:$0xff] %v387_v34   ;;  %415 = vst [vmem:[%s585_s2 + $0x38] sm:$0xff] %v407_v35   ;;  %v382_v38 = vpack.c.bf16 %v193_v36, %v190_v30  ;;  %v402_v39 = vpack.c.bf16 %v225_v37, %v222_v31 }
  0xf3   :  { %410 = vst [vmem:[%s585_s2 + $0x10] sm:$0xff] %v382_v38   ;;  %414 = vst [vmem:[%s585_s2 + $0x30] sm:$0xff] %v402_v39  }

// kernel: gnn_forward.4
= control target key start
LH: loop header
LB: loop body
LE: loop exit
PB: predicated region body
PF: predicated region fallthrough
CT: control target
= control target key end

     0   :  { %s970_s1 = inlined_call_operand.vmem [shape: bf16[128,128], index: 1, kind: input, shape index: {}]   ;;  %s971_s0 = inlined_call_operand.vmem [shape: bf16[128,128], index: 0, kind: input, shape index: {}]   ;;  %s972_s3 = inlined_call_operand.vmem [shape: bf16[128,128], index: 3, kind: input, shape index: {}]   ;;  %s973_s2 = inlined_call_operand.vmem [shape: f32[1,128], index: 2, kind: input, shape index: {}]   ;;  %s974_s4 = inlined_call_operand.vmem [shape: bf16[128,128], index: 4, kind: output, shape index: {}]  }
   0x1   :  { %v822_v0 = vld [vmem:[%s970_s1 + $0x38] sm:$0xff]   ;;  %v823_v1 = vld [vmem:[%s970_s1 + $0x30] sm:$0xff]   ;;  %v824_v2 = vld [vmem:[%s970_s1 + $0x28] sm:$0xff]  }
   0x2   :  { %758 = vmatprep.subr.bf16.mxu0 %v822_v0  ;;  %v825_v3 = vld [vmem:[%s970_s1 + $0x20] sm:$0xff]   ;;  %v826_v5 = vld [vmem:[%s970_s1 + $0x18] sm:$0xff]   ;;  %v827_v6 = vld [vmem:[%s970_s1 + $0x10] sm:$0xff]  }
   0x3   :  { %759 = vmatpush3.bf16.msra.mxu0 %v822_v0  ;;  %v830_v4 = vld [vmem:[%s971_s0] sm:$0xff]   ;;  %v838_v7 = vld [vmem:[%s972_s3 + $0x38] sm:$0xff]   ;;  %v839_v8 = vld [vmem:[%s972_s3 + $0x30] sm:$0xff]  }
   0x4   :  { %760 = vmatprep.subr.bf16.mxu0 %v823_v1  ;;  %774 = vmatprep.mubr.bf16.mxu0 %v830_v4  ;;  %v828_v9 = vld [vmem:[%s970_s1 + $0x8] sm:$0xff]   ;;  %v829_v11 = vld [vmem:[%s970_s1] sm:$0xff]   ;;  %v842_v13 = vld [vmem:[%s972_s3 + $0x18] sm:$0xff]  }
   0x5   :  { %790 = vmatprep.subr.bf16.mxu1 %v838_v7  ;;  %v840_v10 = vld [vmem:[%s972_s3 + $0x28] sm:$0xff]   ;;  %v841_v12 = vld [vmem:[%s972_s3 + $0x20] sm:$0xff]   ;;  %v832_v15 = vld [vmem:[%s971_s0 + $0x10] sm:$0xff]  }
   0x6   :  { %791 = vmatpush3.bf16.msra.mxu1 %v838_v7  ;;  %v831_v14 = vld [vmem:[%s971_s0 + $0x8] sm:$0xff]   ;;  %v833_v16 = vld [vmem:[%s971_s0 + $0x18] sm:$0xff]   ;;  %v834_v17 = vld [vmem:[%s971_s0 + $0x20] sm:$0xff]  }
   0x7   :  { %761 = vmatpush3.bf16.msra.mxu0 %v823_v1  ;;  %792 = vmatprep.subr.bf16.mxu1 %v839_v8  ;;  %v835_v18 = vld [vmem:[%s971_s0 + $0x28] sm:$0xff]   ;;  %v836_v19 = vld [vmem:[%s971_s0 + $0x30] sm:$0xff]   ;;  %v837_v20 = vld [vmem:[%s971_s0 + $0x38] sm:$0xff]  }
   0x8   :  { %762 = vmatprep.subr.bf16.mxu0 %v824_v2  ;;  %v843_v21 = vld [vmem:[%s972_s3 + $0x10] sm:$0xff]   ;;  %v844_v22 = vld [vmem:[%s972_s3 + $0x8] sm:$0xff]   ;;  %v845_v23 = vld [vmem:[%s972_s3] sm:$0xff]  }
   0x9   :  { %v638_v26 = vld [vmem:[%s973_s2] ss:$0 sm:$0xff] }
   0xa   :  { %793 = vmatpush3.bf16.msra.mxu1 %v839_v8 }
   0xb   :  { %763 = vmatpush3.bf16.msra.mxu0 %v824_v2  ;;  %794 = vmatprep.subr.bf16.mxu1 %v840_v10 }
   0xc   :  { %764 = vmatprep.subr.bf16.mxu0 %v825_v3 }
   0xe   :  { %795 = vmatpush3.bf16.msra.mxu1 %v840_v10 }
   0xf   :  { %765 = vmatpush3.bf16.msra.mxu0 %v825_v3  ;;  %796 = vmatprep.subr.bf16.mxu1 %v841_v12 }
  0x10   :  { %766 = vmatprep.subr.bf16.mxu0 %v826_v5 }
  0x12   :  { %797 = vmatpush3.bf16.msra.mxu1 %v841_v12 }
  0x13   :  { %767 = vmatpush3.bf16.msra.mxu0 %v826_v5  ;;  %798 = vmatprep.subr.bf16.mxu1 %v842_v13 }
  0x14   :  { %768 = vmatprep.subr.bf16.mxu0 %v827_v6 }
  0x16   :  { %799 = vmatpush3.bf16.msra.mxu1 %v842_v13 }
  0x17   :  { %769 = vmatpush3.bf16.msra.mxu0 %v827_v6  ;;  %800 = vmatprep.subr.bf16.mxu1 %v843_v21 }
  0x18   :  { %770 = vmatprep.subr.bf16.mxu0 %v828_v9 }
  0x1a   :  { %801 = vmatpush3.bf16.msra.mxu1 %v843_v21 }
  0x1b   :  { %771 = vmatpush3.bf16.msra.mxu0 %v828_v9  ;;  %802 = vmatprep.subr.bf16.mxu1 %v844_v22 }
  0x1c   :  { %772 = vmatprep.subr.bf16.mxu0 %v829_v11 }
  0x1e   :  { %803 = vmatpush3.bf16.msra.mxu1 %v844_v22 }
  0x1f   :  { %773 = vmatpush3.bf16.msra.mxu0 %v829_v11  ;;  %804 = vmatprep.subr.bf16.mxu1 %v845_v23 }
  0x22   :  { %775 = vmatmul.mubr.bf16.vlgmr.msra.gmra.mxu0 %v831_v14  ;;  %805 = vmatpush3.bf16.msra.mxu1 %v845_v23 }
  0x23   :  { %778 = vmatprep.mubr.bf16.mxu0 %v832_v15 }
  0x2a   :  { %779 = vmatmul.mubr.bf16.gmra.mxu0 %v833_v16 }
  0x2b   :  { %782 = vmatprep.mubr.bf16.mxu0 %v834_v17 }
  0x32   :  { %783 = vmatmul.mubr.bf16.gmra.mxu0 %v835_v18 }
  0x33   :  { %786 = vmatprep.mubr.bf16.mxu0 %v836_v19 }
  0x3a   :  { %787 = vmatmul.mubr.bf16.gmra.mxu0 %v837_v20 }
  0xe2   :  { %v776_v24 = vpop.f32.mrf.mxu0 }
  0xe3   :  { %v339_v30 = vadd.f32 %v776_v24, %v638_v26 }
  0xe4   :  { %v216_v25 = vpop.f32.mrf.mxu0 }
  0xe5   :  { %v337_v28 = vadd.f32 %v638_v26, %v216_v25  ;;  %v355_v37 = vmax.f32 %v339_v30, 0.0 }
  0xe6   :  { %v777_v27 = vpop.f32.mrf.mxu0 }
  0xe7   :  { %v340_v29 = vadd.f32 %v777_v27, %v638_v26  ;;  %v353_v35 = vmax.f32 %v337_v28, 0.0 }
  0xe8   :  { %v219_v31 = vpop.f32.mrf.mxu0 }
  0xe9   :  { %v338_v32 = vadd.f32 %v638_v26, %v219_v31  ;;  %v356_v33 = vmax.f32 %v340_v29, 0.0 }
  0xea   :  { %v780_v34 = vpop.f32.mrf.mxu0 }
  0xeb   :  { %v354_v36 = vmax.f32 %v338_v32, 0.0  ;;  %v370_v40 = vpack.c.bf16 %v356_v33, %v355_v37  ;;  %v343_v44 = vadd.f32 %v780_v34, %v638_v26 }
  0xec   :  { %v232_v38 = vpop.f32.mrf.mxu0 }
  0xed   :  { %v369_v39 = vpack.c.bf16 %v354_v36, %v353_v35  ;;  %v341_v42 = vadd.f32 %v638_v26, %v232_v38  ;;  %v359_v51 = vmax.f32 %v343_v44, 0.0 }
  0xee   :  { %v781_v41 = vpop.f32.mrf.mxu0 }
  0xef   :  { %v344_v43 = vadd.f32 %v781_v41, %v638_v26  ;;  %806 = vmatprep.mubr.bf16.mxu1 %v369_v39  ;;  %v357_v49 = vmax.f32 %v341_v42, 0.0 }
  0xf0   :  { %v235_v45 = vpop.f32.mrf.mxu0  ;;  %807 = vmatmul.mubr.bf16.vlgmr.msra.gmra.mxu1 %v370_v40 }
  0xf1   :  { %v342_v46 = vadd.f32 %v638_v26, %v235_v45  ;;  %v360_v47 = vmax.f32 %v344_v43, 0.0 }
  0xf2   :  { %v784_v48 = vpop.f32.mrf.mxu0 }
  0xf3   :  { %v358_v50 = vmax.f32 %v342_v46, 0.0  ;;  %v372_v54 = vpack.c.bf16 %v360_v47, %v359_v51  ;;  %v347_v58 = vadd.f32 %v784_v48, %v638_v26 }
  0xf4   :  { %v248_v52 = vpop.f32.mrf.mxu0 }
  0xf5   :  { %v371_v53 = vpack.c.bf16 %v358_v50, %v357_v49  ;;  %v345_v56 = vadd.f32 %v638_v26, %v248_v52  ;;  %v363_v1 = vmax.f32 %v347_v58, 0.0 }
  0xf6   :  { %v785_v55 = vpop.f32.mrf.mxu0 }
  0xf7   :  { %v348_v57 = vadd.f32 %v785_v55, %v638_v26  ;;  %810 = vmatprep.mubr.bf16.mxu1 %v371_v53  ;;  %v361_v63 = vmax.f32 %v345_v56, 0.0 }
  0xf8   :  { %v251_v59 = vpop.f32.mrf.mxu0  ;;  %811 = vmatmul.mubr.bf16.gmra.mxu1 %v372_v54 }
  0xf9   :  { %v346_v60 = vadd.f32 %v638_v26, %v251_v59  ;;  %v364_v61 = vmax.f32 %v348_v57, 0.0 }
  0xfa   :  { %v788_v62 = vpop.f32.mrf.mxu0 }
  0xfb   :  { %v362_v0 = vmax.f32 %v346_v60, 0.0  ;;  %v374_v4 = vpack.c.bf16 %v364_v61, %v363_v1  ;;  %v351_v8 = vadd.f32 %v788_v62, %v638_v26 }
  0xfc   :  { %v264_v2 = vpop.f32.mrf.mxu0 }
  0xfd   :  { %v373_v3 = vpack.c.bf16 %v362_v0, %v361_v63  ;;  %v349_v6 = vadd.f32 %v638_v26, %v264_v2  ;;  %v367_v14 = vmax.f32 %v351_v8, 0.0 }
  0xfe   :  { %v789_v5 = vpop.f32.mrf.mxu0 }
  0xff   :  { %v352_v7 = vadd.f32 %v789_v5, %v638_v26  ;;  %814 = vmatprep.mubr.bf16.mxu1 %v373_v3  ;;  %v365_v12 = vmax.f32 %v349_v6, 0.0 }
 0x100   :  { %v267_v9 = vpop.f32.mrf.mxu0  ;;  %815 = vmatmul.mubr.bf16.gmra.mxu1 %v374_v4 }
 0x101   :  { %v350_v10 = vadd.f32 %v638_v26, %v267_v9  ;;  %v368_v11 = vmax.f32 %v352_v7, 0.0 }
 0x103   :  { %v366_v13 = vmax.f32 %v350_v10, 0.0  ;;  %v376_v16 = vpack.c.bf16 %v368_v11, %v367_v14 }
 0x105   :  { %v375_v15 = vpack.c.bf16 %v366_v13, %v365_v12 }
 0x107   :  { %818 = vmatprep.mubr.bf16.mxu1 %v375_v15 }
 0x108   :  { %819 = vmatmul.mubr.bf16.gmra.mxu1 %v376_v16 }
 0x1b0   :  { %v808_v17 = vpop.f32.mrf.mxu1 }
 0x1b2   :  { %v475_v18 = vpop.f32.mrf.mxu1 }
 0x1b4   :  { %v809_v19 = vpop.f32.mrf.mxu1 }
 0x1b5   :  { %v687_v20 = vpack.c.bf16 %v809_v19, %v808_v17 }
 0x1b6   :  { %v478_v21 = vpop.f32.mrf.mxu1 }
 0x1b7   :  { %719 = vst [vmem:[%s974_s4 + $0x8] sm:$0xff] %v687_v20   ;;  %v682_v22 = vpack.c.bf16 %v478_v21, %v475_v18 }
 0x1b8   :  { %v812_v23 = vpop.f32.mrf.mxu1 }
 0x1b9   :  { %683 = vst [vmem:[%s974_s4] sm:$0xff] %v682_v22  }
 0x1ba   :  { %v491_v24 = vpop.f32.mrf.mxu1 }
 0x1bc   :  { %v813_v25 = vpop.f32.mrf.mxu1 }
 0x1bd   :  { %v697_v26 = vpack.c.bf16 %v813_v25, %v812_v23 }
 0x1be   :  { %v494_v27 = vpop.f32.mrf.mxu1 }
 0x1bf   :  { %721 = vst [vmem:[%s974_s4 + $0x18] sm:$0xff] %v697_v26   ;;  %v692_v28 = vpack.c.bf16 %v494_v27, %v491_v24 }
 0x1c0   :  { %v816_v29 = vpop.f32.mrf.mxu1 }
 0x1c1   :  { %720 = vst [vmem:[%s974_s4 + $0x10] sm:$0xff] %v692_v28  }
 0x1c2   :  { %v507_v30 = vpop.f32.mrf.mxu1 }
 0x1c4   :  { %v817_v31 = vpop.f32.mrf.mxu1 }
 0x1c5   :  { %v707_v32 = vpack.c.bf16 %v817_v31, %v816_v29 }
 0x1c6   :  { %v510_v33 = vpop.f32.mrf.mxu1 }
 0x1c7   :  { %723 = vst [vmem:[%s974_s4 + $0x28] sm:$0xff] %v707_v32   ;;  %v702_v34 = vpack.c.bf16 %v510_v33, %v507_v30 }
 0x1c8   :  { %v820_v35 = vpop.f32.mrf.mxu1 }
 0x1c9   :  { %722 = vst [vmem:[%s974_s4 + $0x20] sm:$0xff] %v702_v34  }
 0x1ca   :  { %v523_v36 = vpop.f32.mrf.mxu1 }
 0x1cc   :  { %v821_v37 = vpop.f32.mrf.mxu1 }
 0x1cd   :  { %v717_v38 = vpack.c.bf16 %v821_v37, %v820_v35 }
 0x1ce   :  { %v526_v39 = vpop.f32.mrf.mxu1 }
 0x1cf   :  { %725 = vst [vmem:[%s974_s4 + $0x38] sm:$0xff] %v717_v38   ;;  %v712_v40 = vpack.c.bf16 %v526_v39, %v523_v36 }
 0x1d1   :  { %724 = vst [vmem:[%s974_s4 + $0x30] sm:$0xff] %v712_v40  }

</bundles_post_ra>
